<compile_context>
chip_gen: v7x
topology: tpu7x:2x2x1
jax: 0.10.0
libtpu: 0.0.40
codegen_flags: <defaults>
</compile_context>

<pallas_src>
import math

import jax
import jax.numpy as jnp
from jax.experimental import pallas as pl
from jax.experimental.pallas import tpu as pltpu

DROPOUT_RATE = 0.2            # unused at inference time

ROW_ALIGN = 16                # batch-tile row multiple (valid for f32 and bf16 layouts)
MAX_TILE_B = 4096             # upper bound on rows per grid step
SMALL_BATCH_THRESHOLD = 64    # below this, plain fused XLA is faster than a kernel launch


def _round_up(n, m):
    return ((n + m - 1) // m) * m


def _choose_tile_b(B):
    """Large tiles amortize per-step overhead; >=2 grid steps so the batch
    axis can shard across both v7x TensorCores."""
    n_steps = max(2, -(-B // MAX_TILE_B))
    return max(ROW_ALIGN, _round_up(-(-B // n_steps), ROW_ALIGN))


def _mlp_kernel(x_ref, w1_ref, b1_ref, w2_ref, b2_ref, w3_ref, b3_ref, o_ref):
    # Fully fused 3-layer MLP: intermediates never round-trip to HBM.
    # Matmuls accumulate in f32; bias add + ReLU stay in f32 (v5e-safe).
    x = x_ref[...]

    h1 = jnp.dot(x, w1_ref[...], preferred_element_type=jnp.float32) + b1_ref[...]
    h1 = jnp.maximum(h1, 0.0)                     # ReLU; dropout1 = identity (eval)
    h1 = h1.astype(w2_ref.dtype)

    h2 = jnp.dot(h1, w2_ref[...], preferred_element_type=jnp.float32) + b2_ref[...]
    h2 = jnp.maximum(h2, 0.0)                     # ReLU; dropout2 = identity (eval)
    h2 = h2.astype(w3_ref.dtype)

    # Narrow (tile_b, out_dim) store: minor dim equals the full array dim, so
    # this is a legal masked store writing only the true output bytes.
    o_ref[...] = jnp.dot(h2, w3_ref[...], preferred_element_type=jnp.float32) + b3_ref[...]


def _xla_forward(x, params, compute_dtype):
    """Fused XLA dot chain for tiny batches (Pallas launch overhead dominates)."""
    cd = compute_dtype
    h = jnp.dot(x.astype(cd), params["w1"].astype(cd),
                preferred_element_type=jnp.float32) + params["b1"]
    h = jnp.maximum(h, 0.0)
    h = jnp.dot(h.astype(cd), params["w2"].astype(cd),
                preferred_element_type=jnp.float32) + params["b2"]
    h = jnp.maximum(h, 0.0)
    return jnp.dot(h.astype(cd), params["w3"].astype(cd),
                   preferred_element_type=jnp.float32) + params["b3"]


def linear_qnet_forward(x, params, *, compute_dtype=jnp.bfloat16, tile_b=None):
    """x: (B, input_layer) float32.  params: dict of w1,b1,w2,b2,w3,b3
    (weights stored (fan_in, fan_out) -- transposed vs. PyTorch -- and
    biases (1, fan_out)).  Output is float32 (B, output_layer)."""
    B, in_dim = x.shape
    out_dim = params["w3"].shape[1]

    # Tiny batches: skip the kernel entirely (pure overhead at this size).
    if B <= SMALL_BATCH_THRESHOLD:
        return _xla_forward(x, params, compute_dtype)

    # Operand dtypes: weights + activations in compute_dtype (bf16 by default
    # on v6e/v7x for bandwidth), biases stay f32 (added to the f32 accumulator).
    w1 = params["w1"].astype(compute_dtype)
    w2 = params["w2"].astype(compute_dtype)
    w3 = params["w3"].astype(compute_dtype)
    b1 = params["b1"].astype(jnp.float32)
    b2 = params["b2"].astype(jnp.float32)
    b3 = params["b3"].astype(jnp.float32)

    if tile_b is None:
        tile_b = _choose_tile_b(B)
    else:
        tile_b = _round_up(tile_b, ROW_ALIGN)

    b_pad = _round_up(B, tile_b)
    x_in = x.astype(compute_dtype)
    if b_pad != B:
        x_in = jnp.pad(x_in, ((0, b_pad - B), (0, 0)))

    grid = (b_pad // tile_b,)

    const_map = lambda i: (0, 0)   # weights/biases: DMA'd once, stay VMEM-resident
    out = pl.pallas_call(
        _mlp_kernel,
        out_shape=jax.ShapeDtypeStruct((b_pad, out_dim), jnp.float32),
        grid=grid,
        in_specs=[
            # Batch-tiled activations: auto double-buffered pipeline over B.
            pl.BlockSpec((tile_b, in_dim), lambda i: (i, 0)),
            pl.BlockSpec(w1.shape, const_map),
            pl.BlockSpec(b1.shape, const_map),
            pl.BlockSpec(w2.shape, const_map),
            pl.BlockSpec(b2.shape, const_map),
            pl.BlockSpec(w3.shape, const_map),
            pl.BlockSpec(b3.shape, const_map),
        ],
        # True-width output tile: no 4->128 column padding, no wrapper slice.
        out_specs=pl.BlockSpec((tile_b, out_dim), lambda i: (i, 0)),
        compiler_params=pltpu.CompilerParams(
            dimension_semantics=("parallel",),     # shards batch tiles across TCs on v7x
            vmem_limit_bytes=32 * 1024 * 1024,     # explicit budget, valid on v5e/v6e/v7x
        ),
    )(x_in, w1, b1, w2, b2, w3, b3)

    return out if b_pad == B else out[:B]


def init_params(key, input_layer, hidden1, hidden2, output_layer):
    """Deterministic init mimicking PyTorch nn.Linear default
    (uniform +/- 1/sqrt(fan_in) for both weight and bias).
    Weights stored as (fan_in, fan_out), i.e. transposed vs. torch."""
    keys = jax.random.split(key, 6)

    def linear(kw, kb, fan_in, fan_out):
        bound = 1.0 / math.sqrt(fan_in)
        w = jax.random.uniform(kw, (fan_in, fan_out), jnp.float32, -bound, bound)
        b = jax.random.uniform(kb, (1, fan_out), jnp.float32, -bound, bound)
        return w, b

    w1, b1 = linear(keys[0], keys[1], input_layer, hidden1)
    w2, b2 = linear(keys[2], keys[3], hidden1, hidden2)
    w3, b3 = linear(keys[4], keys[5], hidden2, output_layer)
    return {"w1": w1, "b1": b1, "w2": w2, "b2": b2, "w3": w3, "b3": b3}


def _reference(x, params):
    h = jnp.maximum(x @ params["w1"] + params["b1"], 0.0)
    h = jnp.maximum(h @ params["w2"] + params["b2"], 0.0)
    return h @ params["w3"] + params["b3"]


if __name__ == "__main__":
    # Shapes consistent with the module: a Q-network style MLP.
    INPUT, H1, H2, OUT = 16, 32, 32, 4

    key = jax.random.PRNGKey(0)
    kx, kp, kx2 = jax.random.split(key, 3)
    params = init_params(kp, INPUT, H1, H2, OUT)

    # 1) Tiny demo batch (B=2): takes the fused-XLA fast path per the review
    #    (a Pallas launch would be pure overhead here).
    x_small = jax.random.normal(kx, (2, INPUT), dtype=jnp.float32)
    out_small = linear_qnet_forward(x_small, params, compute_dtype=jnp.float32)
    jax.block_until_ready(out_small)
    ref_small = _reference(x_small, params)
    assert out_small.shape == (2, OUT)
    assert jnp.allclose(out_small, ref_small, atol=1e-5, rtol=1e-5)

    # 2) Pallas path: batch large enough to exercise the tiled kernel
    #    (256 rows -> 2 grid steps of 128, weights VMEM-resident).
    Bp = 256
    x_big = jax.random.normal(kx2, (Bp, INPUT), dtype=jnp.float32)
    ref_big = _reference(x_big, params)

    # f32 operands: tight correctness check of the kernel itself.
    out_f32 = linear_qnet_forward(x_big, params, compute_dtype=jnp.float32)
    jax.block_until_ready(out_f32)
    assert out_f32.shape == (Bp, OUT)
    assert jnp.allclose(out_f32, ref_big, atol=1e-5, rtol=1e-5)

    # bf16 operands (default, the v6e/v7x bandwidth path): loosened tolerance.
    out_bf16 = linear_qnet_forward(x_big, params)
    jax.block_until_ready(out_bf16)
    assert out_bf16.shape == (Bp, OUT)
    assert jnp.allclose(out_bf16, ref_big, atol=3e-2, rtol=3e-2)

    print("KERNEL_OK")
</pallas_src>

<mosaic_0001>
module attributes {stable_mosaic.version = 11 : i64} {
  func.func @_mlp_kernel(%arg0: i32, %arg1: memref<128x16xf32, #tpu.memory_space<vmem>>, %arg2: memref<16x32xf32, #tpu.memory_space<vmem>>, %arg3: memref<1x32xf32, #tpu.memory_space<vmem>>, %arg4: memref<32x32xf32, #tpu.memory_space<vmem>>, %arg5: memref<1x32xf32, #tpu.memory_space<vmem>>, %arg6: memref<32x4xf32, #tpu.memory_space<vmem>>, %arg7: memref<1x4xf32, #tpu.memory_space<vmem>>, %arg8: memref<128x4xf32, #tpu.memory_space<vmem>>) attributes {dimension_semantics = [#tpu.dimension_semantics<parallel>], iteration_bounds = array<i64: 2>, scalar_prefetch = 0 : i64, scratch_operands = 0 : i64, tpu.core_type = #tpu.core_type<tc>, window_params = [{transform_indices = @transform_0, window_bounds = array<i64: 128, 16>}, {pipeline_mode = #tpu.pipeline_mode<synchronous>, transform_indices = @transform_1, window_bounds = array<i64: 16, 32>}, {pipeline_mode = #tpu.pipeline_mode<synchronous>, transform_indices = @transform_2, window_bounds = array<i64: 1, 32>}, {pipeline_mode = #tpu.pipeline_mode<synchronous>, transform_indices = @transform_3, window_bounds = array<i64: 32, 32>}, {pipeline_mode = #tpu.pipeline_mode<synchronous>, transform_indices = @transform_4, window_bounds = array<i64: 1, 32>}, {pipeline_mode = #tpu.pipeline_mode<synchronous>, transform_indices = @transform_5, window_bounds = array<i64: 32, 4>}, {pipeline_mode = #tpu.pipeline_mode<synchronous>, transform_indices = @transform_6, window_bounds = array<i64: 1, 4>}, {transform_indices = @transform_7, window_bounds = array<i64: 128, 4>}]} {
    %c0 = arith.constant 0 : index
    %c0_0 = arith.constant 0 : index
    %0 = vector.load %arg1[%c0, %c0_0] : memref<128x16xf32, #tpu.memory_space<vmem>>, vector<128x16xf32>
    %c0_1 = arith.constant 0 : index
    %c0_2 = arith.constant 0 : index
    %1 = vector.load %arg2[%c0_1, %c0_2] : memref<16x32xf32, #tpu.memory_space<vmem>>, vector<16x32xf32>
    %cst = arith.constant dense<0.000000e+00> : vector<128x32xf32>
    %2 = tpu.matmul %0, %1, %cst {dimension_numbers = #tpu.dot_dimension_numbers<[1], [0], [0], [1], [0, 0, 1, 1], [], []>} : vector<128x16xf32>, vector<16x32xf32>, vector<128x32xf32> -> vector<128x32xf32>
    %c0_3 = arith.constant 0 : index
    %c0_4 = arith.constant 0 : index
    %3 = vector.load %arg3[%c0_3, %c0_4] : memref<1x32xf32, #tpu.memory_space<vmem>>, vector<1x32xf32>
    %4 = vector.broadcast %3 : vector<1x32xf32> to vector<128x32xf32>
    %5 = arith.addf %2, %4 : vector<128x32xf32>
    %cst_5 = arith.constant 0.000000e+00 : f32
    %6 = vector.broadcast %cst_5 : f32 to vector<128x32xf32>
    %7 = arith.maximumf %5, %6 : vector<128x32xf32>
    %c0_6 = arith.constant 0 : index
    %c0_7 = arith.constant 0 : index
    %8 = vector.load %arg4[%c0_6, %c0_7] : memref<32x32xf32, #tpu.memory_space<vmem>>, vector<32x32xf32>
    %cst_8 = arith.constant dense<0.000000e+00> : vector<128x32xf32>
    %9 = tpu.matmul %7, %8, %cst_8 {dimension_numbers = #tpu.dot_dimension_numbers<[1], [0], [0], [1], [0, 0, 1, 1], [], []>} : vector<128x32xf32>, vector<32x32xf32>, vector<128x32xf32> -> vector<128x32xf32>
    %c0_9 = arith.constant 0 : index
    %c0_10 = arith.constant 0 : index
    %10 = vector.load %arg5[%c0_9, %c0_10] : memref<1x32xf32, #tpu.memory_space<vmem>>, vector<1x32xf32>
    %11 = vector.broadcast %10 : vector<1x32xf32> to vector<128x32xf32>
    %12 = arith.addf %9, %11 : vector<128x32xf32>
    %cst_11 = arith.constant 0.000000e+00 : f32
    %13 = vector.broadcast %cst_11 : f32 to vector<128x32xf32>
    %14 = arith.maximumf %12, %13 : vector<128x32xf32>
    %c0_12 = arith.constant 0 : index
    %c0_13 = arith.constant 0 : index
    %15 = vector.load %arg6[%c0_12, %c0_13] : memref<32x4xf32, #tpu.memory_space<vmem>>, vector<32x4xf32>
    %cst_14 = arith.constant dense<0.000000e+00> : vector<128x4xf32>
    %16 = tpu.matmul %14, %15, %cst_14 {dimension_numbers = #tpu.dot_dimension_numbers<[1], [0], [0], [1], [0, 0, 1, 1], [], []>} : vector<128x32xf32>, vector<32x4xf32>, vector<128x4xf32> -> vector<128x4xf32>
    %c0_15 = arith.constant 0 : index
    %c0_16 = arith.constant 0 : index
    %17 = vector.load %arg7[%c0_15, %c0_16] : memref<1x4xf32, #tpu.memory_space<vmem>>, vector<1x4xf32>
    %18 = vector.broadcast %17 : vector<1x4xf32> to vector<128x4xf32>
    %19 = arith.addf %16, %18 : vector<128x4xf32>
    %c0_17 = arith.constant 0 : index
    %c0_18 = arith.constant 0 : index
    %20 = vector.load %arg8[%c0_17, %c0_18] : memref<128x4xf32, #tpu.memory_space<vmem>>, vector<128x4xf32>
    tpu.vector_store %arg8[%c0_17, %c0_18], %19 {strides = array<i32>} : memref<128x4xf32, #tpu.memory_space<vmem>>, vector<128x4xf32>,
    return
  }
  func.func @transform_0(%arg0: i32) -> (i32, i32) {
    %c0_i32 = arith.constant 0 : i32
    %c0_i32_0 = arith.constant 0 : i32
    return %arg0, %c0_i32 : i32, i32
  }
  func.func @transform_1(%arg0: i32) -> (i32, i32) {
    %c0_i32 = arith.constant 0 : i32
    %c0_i32_0 = arith.constant 0 : i32
    %c0_i32_1 = arith.constant 0 : i32
    return %c0_i32, %c0_i32_0 : i32, i32
  }
  func.func @transform_2(%arg0: i32) -> (i32, i32) {
    %c0_i32 = arith.constant 0 : i32
    %c0_i32_0 = arith.constant 0 : i32
    %c0_i32_1 = arith.constant 0 : i32
    return %c0_i32, %c0_i32_0 : i32, i32
  }
  func.func @transform_3(%arg0: i32) -> (i32, i32) {
    %c0_i32 = arith.constant 0 : i32
    %c0_i32_0 = arith.constant 0 : i32
    %c0_i32_1 = arith.constant 0 : i32
    return %c0_i32, %c0_i32_0 : i32, i32
  }
  func.func @transform_4(%arg0: i32) -> (i32, i32) {
    %c0_i32 = arith.constant 0 : i32
    %c0_i32_0 = arith.constant 0 : i32
    %c0_i32_1 = arith.constant 0 : i32
    return %c0_i32, %c0_i32_0 : i32, i32
  }
  func.func @transform_5(%arg0: i32) -> (i32, i32) {
    %c0_i32 = arith.constant 0 : i32
    %c0_i32_0 = arith.constant 0 : i32
    %c0_i32_1 = arith.constant 0 : i32
    return %c0_i32, %c0_i32_0 : i32, i32
  }
  func.func @transform_6(%arg0: i32) -> (i32, i32) {
    %c0_i32 = arith.constant 0 : i32
    %c0_i32_0 = arith.constant 0 : i32
    %c0_i32_1 = arith.constant 0 : i32
    return %c0_i32, %c0_i32_0 : i32, i32
  }
  func.func @transform_7(%arg0: i32) -> (i32, i32) {
    %c0_i32 = arith.constant 0 : i32
    %c0_i32_0 = arith.constant 0 : i32
    return %arg0, %c0_i32 : i32, i32
  }
}

</mosaic_0001>

<bundles_post_ra>
// kernel: tpu_custom_call.1
= control target key start
LH: loop header
LB: loop body
LE: loop exit
PB: predicated region body
PF: predicated region fallthrough
CT: control target
= control target key end

     0   :  { %s1305_s24 = smov 0   ;;  %s1468_s0 = inlined_call_operand.vmem [shape: f32[256,16], index: 0, kind: input, shape index: {}]   ;;  %s1469_s1 = inlined_call_operand.vmem [shape: f32[16,32], index: 1, kind: input, shape index: {}]   ;;  %s1470_s2 = inlined_call_operand.vmem [shape: f32[1,32], index: 2, kind: input, shape index: {}]   ;;  %s1471_s3 = inlined_call_operand.vmem [shape: f32[32,32], index: 3, kind: input, shape index: {}]   ;;  %s1472_s4 = inlined_call_operand.vmem [shape: f32[1,32], index: 4, kind: input, shape index: {}]   ;;  %s1473_s5 = inlined_call_operand.vmem [shape: f32[32,4], index: 5, kind: input, shape index: {}]   ;;  %s1474_s6 = inlined_call_operand.vmem [shape: f32[1,4], index: 6, kind: input, shape index: {}]   ;;  %s1475_s7 = inlined_call_operand.vmem [shape: f32[256,4], index: 7, kind: output, shape index: {}]  }
   0x1 LB: > { %s1015_s25 = sadd.s32 4294967295, %s1263_s24   ;;  %p1019_p0 = scmp.ge.s32.totalorder %s1263_s24, 1  ;;  %s1263_s24 = sphi %s1305_s24, %s17_s24  }
   0x2   : > { %p238_p1 = scmp.lt.s32.totalorder %s1263_s24, 3 }
   0x4   : > { %p239_p2 = pnand %p1019_p0, %p238_p1 }
   0x5   : > { %v298_v0 = vld [vmem:[%s1469_s1] sm:$0xff] (!%p239_p2)  ;;  %v299_v1 = vld [vmem:[%s1469_s1 + $0x8] sm:$0xff] (!%p239_p2)  ;;  %s1020_s30 = sshll.u32 (!%p239_p2), %s1015_s25, 4  ;;  %vm307_vm0 = vcmask (!%p239_p2), 130048   ;;  %v519_v6 = vld [vmem:[%s1471_s3 + $0x10] sm:$0xff] (!%p239_p2)  ;;  %vm528_vm1 = vcmask (!%p239_p2), 261120  }
   0x6   : > { %242 = sbr.rel (%p239_p2) target bundleno = 698 (0x2ba), region = 48  ;;  %v517_v2 = vld [vmem:[%s1471_s3] sm:$0xff] (!%p239_p2)  ;;  %v1227_v3 = vpack.c.bf16 (!%p239_p2), %v299_v1, %v298_v0  ;;  %p271_p3 = scmp.lt.s32.totalorder (!%p239_p2), %s1020_s30, 31  ;;  %v518_v4 = vld [vmem:[%s1471_s3 + $0x8] sm:$0xff] (!%p239_p2)  ;;  %v520_v7 = vld [vmem:[%s1471_s3 + $0x18] sm:$0xff] (!%p239_p2)  ;;  %vm942_vm2 = vcmask (!%p239_p2), 31744  }
   0x7   : > { %v1231_v5 = vpack.c.bf16 (!%p239_p2), %v518_v4, %v517_v2  ;;  %v1235_v12 = vpack.c.bf16 (!%p239_p2), %v520_v7, %v519_v6  ;;  %v738_v25 = vld [vmem:[%s1473_s5] sm:$0xff] (!%p239_p2)  ;;  %v739_v26 = vld [vmem:[%s1473_s5 + $0x8] sm:$0xff] (!%p239_p2)  ;;  %v740_v27 = vld [vmem:[%s1473_s5 + $0x10] sm:$0xff] (!%p239_p2) }
   0x8   : > { %1228 = vmatprep.subr.bf16.mxu0 (!%p239_p2), %v1227_v3  ;;  %1247 = vmatprep.subr.bf16.mxu1 (!%p239_p2), %v1227_v3  ;;  %v1239_v28 = vpack.c.bf16 (!%p239_p2), %v739_v26, %v738_v25  ;;  %v741_v29 = vld [vmem:[%s1473_s5 + $0x18] sm:$0xff] (!%p239_p2)  ;;  %v1024_v31 = vld [vmem:[%s1470_s2] ss:$0 sm:$0xff] (!%p239_p2) }
   0x9   : > { %1230 = vmatpush3.bf16.msra.mxu0 (!%p239_p2), %v1227_v3  ;;  %1248 = vmatpush3.bf16.msra.mxu1 (!%p239_p2), %v1227_v3  ;;  %v1243_v30 = vpack.c.bf16 (!%p239_p2), %v741_v29, %v740_v27 }
   0xa   : > { %1232 = vmatprep.subr.bf16.mxu1 (!%p239_p2), %v1231_v5  ;;  %1240 = vmatprep.subr.bf16.mxu0 (!%p239_p2), %v1239_v28 }
   0xd   : > { %s1477_s30 = smov (!%p271_p3, %s1020_s30), 31 }
   0xe   : > { %s1021_s12 = sshll.u32 %s1477_s30, 3 }
   0xf   : > { %s1333_s15 = scalar_lea.vmem %s1468_s0, %s1021_s12  ;;  %s1431_s16 = scalar_lea.vmem %s1475_s7, %s1021_s12 }
  0x10   : > { %v282_v8 = vld [vmem:[%s1333_s15] sm:$0xff]  ;;  %v283_v9 = vld [vmem:[%s1333_s15 + $0x8] sm:$0xff]  ;;  %v284_v10 = vld [vmem:[%s1333_s15 + $0x10] sm:$0xff] }
  0x11   : > { %1139 = vmatprep.mubr.msk.f32.mxu0 %vm307_vm0, %v282_v8  ;;  %v290_v11 = vld [vmem:[%s1333_s15 + $0x40] sm:$0xff]  ;;  %v285_v13 = vld [vmem:[%s1333_s15 + $0x18] sm:$0xff]  ;;  %v291_v14 = vld [vmem:[%s1333_s15 + $0x48] sm:$0xff] }
  0x12   : > { %1140 = vmatmul.mubr.msk.f32.vlgmr.msra.gmra.mrb[0].mxu0 %vm307_vm0, %v283_v9  ;;  %1151 = vmatprep.mubr.msk.f32.mxu1 %vm307_vm0, %v290_v11  ;;  %v292_v15 = vld [vmem:[%s1333_s15 + $0x50] sm:$0xff]  ;;  %v286_v16 = vld [vmem:[%s1333_s15 + $0x20] sm:$0xff]  ;;  %v293_v17 = vld [vmem:[%s1333_s15 + $0x58] sm:$0xff] }
  0x13   : > { %1142 = vmatprep.mubr.msk.f32.mxu0 %vm307_vm0, %v284_v10  ;;  %1152 = vmatmul.mubr.msk.f32.vlgmr.msra.gmra.mrb[0].mxu1 %vm307_vm0, %v291_v14  ;;  %v294_v18 = vld [vmem:[%s1333_s15 + $0x60] sm:$0xff]  ;;  %v287_v19 = vld [vmem:[%s1333_s15 + $0x28] sm:$0xff]  ;;  %v288_v20 = vld [vmem:[%s1333_s15 + $0x30] sm:$0xff] }
  0x14   : > { %1154 = vmatprep.mubr.msk.f32.mxu1 %vm307_vm0, %v292_v15  ;;  %1234 = vmatpush3.bf16.msra.mxu1 %v1231_v5  ;;  %v295_v21 = vld [vmem:[%s1333_s15 + $0x68] sm:$0xff]  ;;  %v296_v22 = vld [vmem:[%s1333_s15 + $0x70] sm:$0xff]  ;;  %v289_v23 = vld [vmem:[%s1333_s15 + $0x38] sm:$0xff] }
  0x15   : > { %1236 = vmatprep.subr.bf16.mxu1 %v1235_v12  ;;  %v297_v24 = vld [vmem:[%s1333_s15 + $0x78] sm:$0xff]  ;;  %1242 = vmatpush3.bf16.msra.mxu0 %v1239_v28 }
  0x16   : > { %1143 = vmatmul.mubr.msk.f32.gmra.mrb[2].mxu0 %vm307_vm0, %v285_v13  ;;  %1244 = vmatprep.subr.bf16.mxu0 %v1243_v30 }
  0x17   : > { %1145 = vmatprep.mubr.msk.f32.mxu0 %vm307_vm0, %v286_v16  ;;  %1155 = vmatmul.mubr.msk.f32.gmra.mrb[2].mxu1 %vm307_vm0, %v293_v17  ;;  %v1041_v16 = vld [vmem:[%s1472_s4] ss:$0 sm:$0xff] }
  0x18   : > { %1157 = vmatprep.mubr.msk.f32.mxu1 %vm307_vm0, %v294_v18  ;;  %1238 = vmatpush3.bf16.msra.mxu1 %v1235_v12 }
  0x19   : > { %1246 = vmatpush3.bf16.msra.mxu0 %v1243_v30 }
  0x1a   : > { %1146 = vmatmul.mubr.msk.f32.gmra.mrb[4].mxu0 %vm307_vm0, %v287_v19 }
  0x1b   : > { %1148 = vmatprep.mubr.msk.f32.mxu0 %vm307_vm0, %v288_v20  ;;  %1158 = vmatmul.mubr.msk.f32.gmra.mrb[4].mxu1 %vm307_vm0, %v295_v21 }
  0x1c   : > { %1160 = vmatprep.mubr.msk.f32.mxu1 %vm307_vm0, %v296_v22 }
  0x1e   : > { %1149 = vmatmul.mubr.msk.f32.gmra.mrb[6].mxu0 %vm307_vm0, %v289_v23 }
  0x1f   : > { %1161 = vmatmul.mubr.msk.f32.gmra.mrb[6].mxu1 %vm307_vm0, %v297_v24 }
  0xe5   : > { %v1141_v32 = vpop.f32.mrb[0].mxu0 }
  0xe6   : > { %v428_v33 = vadd.f32 %v1141_v32, %v1024_v31  ;;  %v422_v34 = vpop.f32.mrb[1].mxu0  ;;  %v1153_v36 = vpop.f32.mrb[0].mxu1 }
  0xe7   : > { %v423_v35 = vadd.f32 %v1024_v31, %v422_v34  ;;  %v462_v37 = vpop.f32.mrb[1].mxu1  ;;  %v468_v3 = vadd.f32 %v1153_v36, %v1024_v31 }
  0xe8   : > { %v502_v40 = vmax.f32 %v428_v33, 0.0  ;;  %v463_v56 = vadd.f32 %v1024_v31, %v462_v37 }
  0xe9   : > { %v501_v38 = vmax.f32 %v423_v35, 0.0  ;;  %v1144_v39 = vpop.f32.mrb[2].mxu0  ;;  %v510_v6 = vmax.f32 %v468_v3, 0.0 }
  0xea   : > { %v438_v41 = vadd.f32 %v1144_v39, %v1024_v31  ;;  %v432_v42 = vpop.f32.mrb[3].mxu0  ;;  %v1156_v44 = vpop.f32.mrb[2].mxu1  ;;  %v509_v0 = vmax.f32 %v463_v56, 0.0 }
  0xeb   : > { %v433_v43 = vadd.f32 %v1024_v31, %v432_v42  ;;  %1171 = vmatprep.mubr.msk.f32.mxu1 %vm528_vm1, %v501_v38  ;;  %v472_v45 = vpop.f32.mrb[3].mxu1  ;;  %v478_v7 = vadd.f32 %v1156_v44, %v1024_v31 }
  0xec   : > { %1172 = vmatmul.mubr.msk.f32.vlgmr.msra.gmra.mrb[8].mxu1 %vm528_vm1, %v502_v40  ;;  %v504_v48 = vmax.f32 %v438_v41, 0.0  ;;  %v473_v1 = vadd.f32 %v1024_v31, %v472_v45 }
  0xed   : > { %v503_v46 = vmax.f32 %v433_v43, 0.0  ;;  %v1147_v47 = vpop.f32.mrb[4].mxu0  ;;  %v512_v10 = vmax.f32 %v478_v7, 0.0 }
  0xee   : > { %v448_v49 = vadd.f32 %v1147_v47, %v1024_v31  ;;  %v442_v50 = vpop.f32.mrb[5].mxu0  ;;  %v1159_v52 = vpop.f32.mrb[4].mxu1  ;;  %v511_v4 = vmax.f32 %v473_v1, 0.0  ;;  %v1058_v1 = vld [vmem:[%s1474_s6] ss:$0 sm:$0xff] }
  0xef   : > { %v443_v51 = vadd.f32 %v1024_v31, %v442_v50  ;;  %1174 = vmatprep.mubr.msk.f32.mxu1 %vm528_vm1, %v503_v46  ;;  %v482_v53 = vpop.f32.mrb[5].mxu1  ;;  %v488_v11 = vadd.f32 %v1159_v52, %v1024_v31 }
  0xf0   : > { %1175 = vmatmul.mubr.msk.f32.gmra.mrb[10].mxu1 %vm528_vm1, %v504_v48  ;;  %v506_v57 = vmax.f32 %v448_v49, 0.0  ;;  %v483_v5 = vadd.f32 %v1024_v31, %v482_v53 }
  0xf1   : > { %v505_v54 = vmax.f32 %v443_v51, 0.0  ;;  %v1150_v55 = vpop.f32.mrb[6].mxu0  ;;  %v514_v13 = vmax.f32 %v488_v11, 0.0 }
  0xf2   : > { %v458_v58 = vadd.f32 %v1150_v55, %v1024_v31  ;;  %v452_v59 = vpop.f32.mrb[7].mxu0  ;;  %v1162_v61 = vpop.f32.mrb[6].mxu1  ;;  %v513_v8 = vmax.f32 %v483_v5, 0.0 }
  0xf3   : > { %v453_v60 = vadd.f32 %v1024_v31, %v452_v59  ;;  %1177 = vmatprep.mubr.msk.f32.mxu1 %vm528_vm1, %v505_v54  ;;  %v492_v62 = vpop.f32.mrb[7].mxu1  ;;  %v498_v14 = vadd.f32 %v1162_v61, %v1024_v31 }
  0xf4   : > { %1178 = vmatmul.mubr.msk.f32.gmra.mrb[12].mxu1 %vm528_vm1, %v506_v57  ;;  %v508_v2 = vmax.f32 %v458_v58, 0.0  ;;  %v493_v9 = vadd.f32 %v1024_v31, %v492_v62 }
  0xf5   : > { %v507_v63 = vmax.f32 %v453_v60, 0.0  ;;  %v516_v15 = vmax.f32 %v498_v14, 0.0 }
  0xf6   : > { %v515_v12 = vmax.f32 %v493_v9, 0.0 }
  0xf7   : > { %1180 = vmatprep.mubr.msk.f32.mxu1 %vm528_vm1, %v507_v63 }
  0xf8   : > { %1181 = vmatmul.mubr.msk.f32.gmra.mrb[14].mxu1 %vm528_vm1, %v508_v2 }
  0xf9   : > { %1183 = vmatprep.mubr.msk.f32.mxu1 %vm528_vm1, %v509_v0 }
  0xfc   : > { %1184 = vmatmul.mubr.msk.f32.gmra.mrb[16].mxu1 %vm528_vm1, %v510_v6 }
  0xfd   : > { %1186 = vmatprep.mubr.msk.f32.mxu1 %vm528_vm1, %v511_v4 }
 0x100   : > { %1187 = vmatmul.mubr.msk.f32.gmra.mrb[18].mxu1 %vm528_vm1, %v512_v10 }
 0x101   : > { %1189 = vmatprep.mubr.msk.f32.mxu1 %vm528_vm1, %v513_v8 }
 0x104   : > { %1190 = vmatmul.mubr.msk.f32.gmra.mrb[20].mxu1 %vm528_vm1, %v514_v13 }
 0x105   : > { %1192 = vmatprep.mubr.msk.f32.mxu1 %vm528_vm1, %v515_v12 }
 0x108   : > { %1193 = vmatmul.mubr.msk.f32.gmra.mrb[22].mxu1 %vm528_vm1, %v516_v15 }
 0x1bf   : > { %v1173_v17 = vpop.f32.mrb[8].mxu1 }
 0x1c0   : > { %v649_v18 = vadd.f32 %v1173_v17, %v1041_v16  ;;  %v643_v19 = vpop.f32.mrb[9].mxu1 }
 0x1c1   : > { %v644_v20 = vadd.f32 %v1041_v16, %v643_v19 }
 0x1c2   : > { %v723_v23 = vmax.f32 %v649_v18, 0.0 }
 0x1c3   : > { %v722_v21 = vmax.f32 %v644_v20, 0.0  ;;  %v1176_v22 = vpop.f32.mrb[10].mxu1 }
 0x1c4   : > { %v659_v24 = vadd.f32 %v1176_v22, %v1041_v16  ;;  %v653_v25 = vpop.f32.mrb[11].mxu1 }
 0x1c5   : > { %v654_v26 = vadd.f32 %v1041_v16, %v653_v25  ;;  %1203 = vmatprep.mubr.msk.f32.mxu0 %vm528_vm1, %v722_v21 }
 0x1c6   : > { %1204 = vmatmul.mubr.msk.f32.vlgmr.msra.gmra.mrb[8].mxu0 %vm528_vm1, %v723_v23  ;;  %v725_v29 = vmax.f32 %v659_v24, 0.0 }
 0x1c7   : > { %v724_v27 = vmax.f32 %v654_v26, 0.0  ;;  %v1179_v28 = vpop.f32.mrb[12].mxu1 }
 0x1c8   : > { %v669_v30 = vadd.f32 %v1179_v28, %v1041_v16  ;;  %v663_v31 = vpop.f32.mrb[13].mxu1 }
 0x1c9   : > { %v664_v32 = vadd.f32 %v1041_v16, %v663_v31  ;;  %1206 = vmatprep.mubr.msk.f32.mxu0 %vm528_vm1, %v724_v27 }
 0x1ca   : > { %1207 = vmatmul.mubr.msk.f32.gmra.mrb[10].mxu0 %vm528_vm1, %v725_v29  ;;  %v727_v35 = vmax.f32 %v669_v30, 0.0 }
 0x1cb   : > { %v726_v33 = vmax.f32 %v664_v32, 0.0  ;;  %v1182_v34 = vpop.f32.mrb[14].mxu1 }
 0x1cc   : > { %v679_v36 = vadd.f32 %v1182_v34, %v1041_v16  ;;  %v673_v37 = vpop.f32.mrb[15].mxu1 }
 0x1cd   : > { %v674_v38 = vadd.f32 %v1041_v16, %v673_v37  ;;  %1209 = vmatprep.mubr.msk.f32.mxu0 %vm528_vm1, %v726_v33 }
 0x1ce   : > { %1210 = vmatmul.mubr.msk.f32.gmra.mrb[12].mxu0 %vm528_vm1, %v727_v35  ;;  %v729_v41 = vmax.f32 %v679_v36, 0.0 }
 0x1cf   : > { %v728_v39 = vmax.f32 %v674_v38, 0.0  ;;  %v1185_v40 = vpop.f32.mrb[16].mxu1 }
 0x1d0   : > { %v689_v42 = vadd.f32 %v1185_v40, %v1041_v16  ;;  %v683_v43 = vpop.f32.mrb[17].mxu1 }
 0x1d1   : > { %v684_v44 = vadd.f32 %v1041_v16, %v683_v43  ;;  %1212 = vmatprep.mubr.msk.f32.mxu0 %vm528_vm1, %v728_v39 }
 0x1d2   : > { %1213 = vmatmul.mubr.msk.f32.gmra.mrb[14].mxu0 %vm528_vm1, %v729_v41  ;;  %v731_v47 = vmax.f32 %v689_v42, 0.0 }
 0x1d3   : > { %v730_v45 = vmax.f32 %v684_v44, 0.0  ;;  %v1188_v46 = vpop.f32.mrb[18].mxu1 }
 0x1d4   : > { %v699_v48 = vadd.f32 %v1188_v46, %v1041_v16  ;;  %v693_v49 = vpop.f32.mrb[19].mxu1 }
 0x1d5   : > { %v694_v50 = vadd.f32 %v1041_v16, %v693_v49  ;;  %1215 = vmatprep.mubr.msk.f32.mxu0 %vm528_vm1, %v730_v45 }
 0x1d6   : > { %1216 = vmatmul.mubr.msk.f32.gmra.mrb[16].mxu0 %vm528_vm1, %v731_v47  ;;  %v733_v53 = vmax.f32 %v699_v48, 0.0 }
 0x1d7   : > { %v732_v51 = vmax.f32 %v694_v50, 0.0  ;;  %v1191_v52 = vpop.f32.mrb[20].mxu1 }
 0x1d8   : > { %v709_v54 = vadd.f32 %v1191_v52, %v1041_v16  ;;  %v703_v55 = vpop.f32.mrb[21].mxu1 }
 0x1d9   : > { %v704_v56 = vadd.f32 %v1041_v16, %v703_v55  ;;  %1218 = vmatprep.mubr.msk.f32.mxu0 %vm528_vm1, %v732_v51 }
 0x1da   : > { %1219 = vmatmul.mubr.msk.f32.gmra.mrb[18].mxu0 %vm528_vm1, %v733_v53  ;;  %v735_v59 = vmax.f32 %v709_v54, 0.0 }
 0x1db   : > { %v734_v57 = vmax.f32 %v704_v56, 0.0  ;;  %v1194_v58 = vpop.f32.mrb[22].mxu1 }
 0x1dc   : > { %v719_v60 = vadd.f32 %v1194_v58, %v1041_v16  ;;  %v713_v61 = vpop.f32.mrb[23].mxu1 }
 0x1dd   : > { %v714_v62 = vadd.f32 %v1041_v16, %v713_v61  ;;  %1221 = vmatprep.mubr.msk.f32.mxu0 %vm528_vm1, %v734_v57 }
 0x1de   : > { %1222 = vmatmul.mubr.msk.f32.gmra.mrb[20].mxu0 %vm528_vm1, %v735_v59  ;;  %v737_v0 = vmax.f32 %v719_v60, 0.0 }
 0x1df   : > { %v736_v63 = vmax.f32 %v714_v62, 0.0 }
 0x1e1   : > { %1224 = vmatprep.mubr.msk.f32.mxu0 %vm528_vm1, %v736_v63 }
 0x1e2   : > { %1225 = vmatmul.mubr.msk.f32.gmra.mrb[22].mxu0 %vm528_vm1, %v737_v0 }
 0x299   : > { %v1205_v2 = vpop.f32.mrb[8].mxu0 }
 0x29a   : > { %v869_v3 = vadd.f32 %v1205_v2, %v1058_v1  ;;  %v863_v4 = vpop.f32.mrb[9].mxu0 }
 0x29b   : > { %v864_v5 = vadd.f32 %v1058_v1, %v863_v4 }
 0x29c   : > { %944 = vst.msk [vmem:[%s1431_s16 + $0x8] sm:$0xff] %vm942_vm2, %v869_v3 }
 0x29d   : > { %943 = vst.msk [vmem:[%s1431_s16] sm:$0xff] %vm942_vm2, %v864_v5  ;;  %v1208_v6 = vpop.f32.mrb[10].mxu0 }
 0x29e   : > { %v879_v7 = vadd.f32 %v1208_v6, %v1058_v1  ;;  %v873_v8 = vpop.f32.mrb[11].mxu0 }
 0x29f   : > { %v874_v9 = vadd.f32 %v1058_v1, %v873_v8 }
 0x2a0   : > { %946 = vst.msk [vmem:[%s1431_s16 + $0x18] sm:$0xff] %vm942_vm2, %v879_v7 }
 0x2a1   : > { %945 = vst.msk [vmem:[%s1431_s16 + $0x10] sm:$0xff] %vm942_vm2, %v874_v9  ;;  %v1211_v10 = vpop.f32.mrb[12].mxu0 }
 0x2a2   : > { %v889_v11 = vadd.f32 %v1211_v10, %v1058_v1  ;;  %v883_v12 = vpop.f32.mrb[13].mxu0 }
 0x2a3   : > { %v884_v13 = vadd.f32 %v1058_v1, %v883_v12 }
 0x2a4   : > { %948 = vst.msk [vmem:[%s1431_s16 + $0x28] sm:$0xff] %vm942_vm2, %v889_v11 }
 0x2a5   : > { %947 = vst.msk [vmem:[%s1431_s16 + $0x20] sm:$0xff] %vm942_vm2, %v884_v13  ;;  %v1214_v14 = vpop.f32.mrb[14].mxu0 }
 0x2a6   : > { %v899_v15 = vadd.f32 %v1214_v14, %v1058_v1  ;;  %v893_v16 = vpop.f32.mrb[15].mxu0 }
 0x2a7   : > { %v894_v17 = vadd.f32 %v1058_v1, %v893_v16 }
 0x2a8   : > { %950 = vst.msk [vmem:[%s1431_s16 + $0x38] sm:$0xff] %vm942_vm2, %v899_v15 }
 0x2a9   : > { %949 = vst.msk [vmem:[%s1431_s16 + $0x30] sm:$0xff] %vm942_vm2, %v894_v17  ;;  %v1217_v18 = vpop.f32.mrb[16].mxu0 }
 0x2aa   : > { %v909_v19 = vadd.f32 %v1217_v18, %v1058_v1  ;;  %v903_v20 = vpop.f32.mrb[17].mxu0 }
 0x2ab   : > { %v904_v21 = vadd.f32 %v1058_v1, %v903_v20 }
 0x2ac   : > { %952 = vst.msk [vmem:[%s1431_s16 + $0x48] sm:$0xff] %vm942_vm2, %v909_v19 }
 0x2ad   : > { %951 = vst.msk [vmem:[%s1431_s16 + $0x40] sm:$0xff] %vm942_vm2, %v904_v21  ;;  %v1220_v22 = vpop.f32.mrb[18].mxu0 }
 0x2ae   : > { %v919_v23 = vadd.f32 %v1220_v22, %v1058_v1  ;;  %v913_v24 = vpop.f32.mrb[19].mxu0 }
 0x2af   : > { %v914_v25 = vadd.f32 %v1058_v1, %v913_v24 }
 0x2b0   : > { %954 = vst.msk [vmem:[%s1431_s16 + $0x58] sm:$0xff] %vm942_vm2, %v919_v23 }
 0x2b1   : > { %953 = vst.msk [vmem:[%s1431_s16 + $0x50] sm:$0xff] %vm942_vm2, %v914_v25  ;;  %v1223_v26 = vpop.f32.mrb[20].mxu0 }
 0x2b2   : > { %v929_v27 = vadd.f32 %v1223_v26, %v1058_v1  ;;  %v923_v28 = vpop.f32.mrb[21].mxu0 }
 0x2b3   : > { %v924_v29 = vadd.f32 %v1058_v1, %v923_v28 }
 0x2b4   : > { %956 = vst.msk [vmem:[%s1431_s16 + $0x68] sm:$0xff] %vm942_vm2, %v929_v27 }
 0x2b5   : > { %955 = vst.msk [vmem:[%s1431_s16 + $0x60] sm:$0xff] %vm942_vm2, %v924_v29  ;;  %v1226_v30 = vpop.f32.mrb[22].mxu0 }
 0x2b6   : > { %v939_v31 = vadd.f32 %v1226_v30, %v1058_v1  ;;  %v933_v32 = vpop.f32.mrb[23].mxu0 }
 0x2b7   : > { %v934_v33 = vadd.f32 %v1058_v1, %v933_v32 }
 0x2b8   : > { %958 = vst.msk [vmem:[%s1431_s16 + $0x78] sm:$0xff] %vm942_vm2, %v939_v31 }
 0x2b9   : > { %957 = vst.msk [vmem:[%s1431_s16 + $0x70] sm:$0xff] %vm942_vm2, %v934_v33 }
 0x2ba PF: > { %s17_s24 = sadd.s32 1, %s1263_s24  }
 0x2bb   : > { %p14_p4 = scmp.ge.s32.totalorder %s17_s24, 4  }
 0x2bd   :  { %16 = sbr.rel (!%p14_p4) target bundleno = 1 (0x1), region = 78 }

</bundles_post_ra>
